<compile_context>
chip_gen: v6e
topology: v6e:2x2x1
jax: 0.10.0
libtpu: 0.0.40
codegen_flags: <defaults>
</compile_context>

<pallas_src>
import jax
import jax.numpy as jnp
from jax.experimental import pallas as pl
from jax.experimental.pallas import tpu as pltpu


# ----------------------------------------------------------------------------
# Trace-time chunking policy (all Python; no runtime cost).
# ----------------------------------------------------------------------------
_MAX_OUTSTANDING_DMAS = 4          # a few concurrent DMAs is enough to saturate HBM
_CHUNK_THRESHOLD_BYTES = 8 << 20   # below this, one whole-array DMA is plenty


def _make_dma_copy_kernel(slices):
    """Kernel that copies HBM->HBM via `len(slices)` concurrent async DMAs.

    `slices` is a static tuple of (start, size) windows over the leading dim
    that exactly covers the array. All indices are trace-time constants.
    """

    def kernel(x_hbm, o_hbm, sems):
        # Issue every DMA first (they run concurrently on the DMA engines) ...
        for c, (start, size) in enumerate(slices):
            pltpu.make_async_copy(
                x_hbm.at[pl.ds(start, size)],
                o_hbm.at[pl.ds(start, size)],
                sems.at[c],
            ).start()
        # ... then wait for all of them.
        for c, (start, size) in enumerate(slices):
            pltpu.make_async_copy(
                x_hbm.at[pl.ds(start, size)],
                o_hbm.at[pl.ds(start, size)],
                sems.at[c],
            ).wait()

    return kernel


# ----------------------------------------------------------------------------
# Public API
# ----------------------------------------------------------------------------
def identity_map(x, *args, **kwargs):
    """Pallas equivalent of IdentityMap.forward: returns x unchanged.

    The fastest identity is no data movement at all, so this path emits no
    kernel and no HBM traffic. Extra *args/**kwargs are accepted and ignored,
    matching the PyTorch module signature.
    """
    del args, kwargs
    return x


def identity_map_pallas(x, *args, min_bytes_to_chunk=_CHUNK_THRESHOLD_BYTES, **kwargs):
    """Identity as an explicit, materialized copy via direct HBM->HBM DMA.

    Only use when a fresh buffer is genuinely required (e.g. to break
    aliasing); it pays 2N bytes of HBM traffic but no VMEM staging, no
    TensorCore load/store work and no per-block pipeline overhead.
    """
    del args, kwargs
    orig_shape = x.shape

    if x.size == 0:
        return x  # nothing to copy

    # 0-d arrays: give the DMA a rank>=1 view (pure metadata reshape).
    work = x.reshape(1, 1) if x.ndim == 0 else x
    rows = work.shape[0]
    itemsize = jnp.dtype(work.dtype).itemsize
    total_bytes = int(work.size) * itemsize

    # Chunk only when the copy is big enough for concurrency to matter.
    if rows <= 1 or total_bytes < min_bytes_to_chunk:
        n_chunks = 1
    else:
        n_chunks = min(_MAX_OUTSTANDING_DMAS, rows)
    chunk_rows = pl.cdiv(rows, n_chunks)

    slices = []
    start = 0
    while start < rows:
        size = min(chunk_rows, rows - start)
        slices.append((start, size))
        start += size
    slices = tuple(slices)

    out = pl.pallas_call(
        _make_dma_copy_kernel(slices),
        out_shape=jax.ShapeDtypeStruct(work.shape, work.dtype),
        in_specs=[pl.BlockSpec(memory_space=pl.ANY)],   # raw HBM ref, no auto-DMA
        out_specs=pl.BlockSpec(memory_space=pl.ANY),    # written directly by DMA
        scratch_shapes=[pltpu.SemaphoreType.DMA((len(slices),))],
        cost_estimate=pl.CostEstimate(
            flops=0, transcendentals=0, bytes_accessed=2 * total_bytes),
    )(work)

    return out.reshape(orig_shape) if x.ndim == 0 else out


# config property of the PyTorch module (no parameters, nothing to initialize)
IDENTITY_MAP_CONFIG = {"mm_projector_type": "identity"}


if __name__ == "__main__":
    key = jax.random.PRNGKey(0)
    # Typical projector input: [batch, seq, hidden]
    x = jax.random.normal(key, (2, 8, 32), dtype=jnp.float32)

    # Default path: zero-copy identity (the real optimum for this module).
    y_fast = identity_map(x)
    assert y_fast is x

    # Explicit Pallas copy path: single whole-array HBM->HBM DMA.
    y = identity_map_pallas(x)
    y = jax.block_until_ready(y)
    assert y.shape == x.shape
    assert y.dtype == x.dtype
    assert bool(jnp.all(y == x))

    # Exercise the multi-chunk (concurrent DMA) path at a small size too.
    y2 = identity_map_pallas(x, min_bytes_to_chunk=0)
    y2 = jax.block_until_ready(y2)
    assert y2.shape == x.shape
    assert y2.dtype == x.dtype
    assert bool(jnp.all(y2 == x))

    print("KERNEL_OK")
</pallas_src>

<mosaic_0001>
module attributes {stable_mosaic.version = 11 : i64} {
  func.func @kernel(%arg0: memref<2x8x32xf32, #tpu.memory_space<any>>, %arg1: memref<2x8x32xf32, #tpu.memory_space<any>>, %arg2: memref<1x!tpu.dma_semaphore, #tpu.memory_space<semaphore_mem>>) attributes {dimension_semantics = [], scalar_prefetch = 0 : i64, scratch_operands = 1 : i64, tpu.core_type = #tpu.core_type<tc>} {
    %c0_i32 = arith.constant 0 : i32
    %c0_i32_0 = arith.constant 0 : i32
    %c0_i32_1 = arith.constant 0 : i32
    %c0_i32_2 = arith.constant 0 : i32
    %0 = tpu.memref_slice %arg0[%c0_i32_0, %c0_i32_1, %c0_i32_2] : memref<2x8x32xf32, #tpu.memory_space<any>> -> memref<2x8x32xf32, #tpu.memory_space<any>>
    %c0_i32_3 = arith.constant 0 : i32
    %c0_i32_4 = arith.constant 0 : i32
    %c0_i32_5 = arith.constant 0 : i32
    %1 = tpu.memref_slice %arg1[%c0_i32_3, %c0_i32_4, %c0_i32_5] : memref<2x8x32xf32, #tpu.memory_space<any>> -> memref<2x8x32xf32, #tpu.memory_space<any>>
    %2 = tpu.memref_slice %arg2[%c0_i32] : memref<1x!tpu.dma_semaphore, #tpu.memory_space<semaphore_mem>> -> memref<1x!tpu.dma_semaphore, #tpu.memory_space<semaphore_mem>>
    %3 = tpu.memref_squeeze %2 : memref<1x!tpu.dma_semaphore, #tpu.memory_space<semaphore_mem>> -> memref<!tpu.dma_semaphore, #tpu.memory_space<semaphore_mem>>
    tpu.enqueue_dma source(%0 : memref<2x8x32xf32, #tpu.memory_space<any>>) target(%1 : memref<2x8x32xf32, #tpu.memory_space<any>>) target_semaphore(%3 : memref<!tpu.dma_semaphore, #tpu.memory_space<semaphore_mem>>)
    %c0_i32_6 = arith.constant 0 : i32
    %c0_i32_7 = arith.constant 0 : i32
    %c0_i32_8 = arith.constant 0 : i32
    %c0_i32_9 = arith.constant 0 : i32
    %4 = tpu.memref_slice %arg0[%c0_i32_7, %c0_i32_8, %c0_i32_9] : memref<2x8x32xf32, #tpu.memory_space<any>> -> memref<2x8x32xf32, #tpu.memory_space<any>>
    %c0_i32_10 = arith.constant 0 : i32
    %c0_i32_11 = arith.constant 0 : i32
    %c0_i32_12 = arith.constant 0 : i32
    %5 = tpu.memref_slice %arg1[%c0_i32_10, %c0_i32_11, %c0_i32_12] : memref<2x8x32xf32, #tpu.memory_space<any>> -> memref<2x8x32xf32, #tpu.memory_space<any>>
    %6 = tpu.memref_slice %arg2[%c0_i32_6] : memref<1x!tpu.dma_semaphore, #tpu.memory_space<semaphore_mem>> -> memref<1x!tpu.dma_semaphore, #tpu.memory_space<semaphore_mem>>
    %7 = tpu.memref_squeeze %6 : memref<1x!tpu.dma_semaphore, #tpu.memory_space<semaphore_mem>> -> memref<!tpu.dma_semaphore, #tpu.memory_space<semaphore_mem>>
    tpu.wait_dma2 semaphore(%7 : memref<!tpu.dma_semaphore, #tpu.memory_space<semaphore_mem>>) src(%4 : memref<2x8x32xf32, #tpu.memory_space<any>>) dst(%5 : memref<2x8x32xf32, #tpu.memory_space<any>>)
    return
  }
}

</mosaic_0001>

<bundles_post_ra>
// kernel: tpu_custom_call.1
= control target key start
LH: loop header
LB: loop body
LE: loop exit
PB: predicated region body
PF: predicated region fallthrough
CT: control target
= control target key end

     0   :  { %s29_s6 = smov [#allocation2]   ;;  %s30_s7 = smov 131072   ;;  %s48_s0 = inlined_call_operand.hbm [shape: f32[2,8,32], index: 0, kind: input, shape index: {}]   ;;  %s49_s1 = inlined_call_operand.hbm [shape: f32[2,8,32], index: 1, kind: output, shape index: {}]  }
   0x1   :  { %s31_s8 = smov 0  }
   0x2   :  { %12 = dma.general %s48_s0, 256, %s49_s1, %s29_s6, %s30_s7, [#allocation4], %s31_s8, 0  }
   0x3   :  { %27 = dma.done.wait [#allocation2], 256 }
   0x4   :  { %28 = vsyncadd [#allocation2], 4294967040 }
   0x5   :  { %17 = vsyncmov [#allocation2] }
   0x8   :  { %s18_s13 = vpop.sfrf %17 }
   0x9   :  { %p23_p0 = scmp.ne.s32.totalorder %s18_s13, 0 }
   0xb   :  { %22 = shalt.err (%p23_p0)  }

</bundles_post_ra>
